<compile_context>
chip_gen: v7x
topology: tpu7x:2x2x1
jax: 0.10.0
libtpu: 0.0.40
codegen_flags: <defaults>
</compile_context>

<pallas_src>
import functools

import jax
import jax.numpy as jnp
from jax.experimental import pallas as pl
from jax.experimental.pallas import tpu as pltpu


def _layernorm_kernel(x_ref, g_ref, b_ref, o_ref, *, eps, d_valid, d_padded):
    # x_ref: (block_rows, D_pad), g_ref/b_ref: (1, D_pad) f32, o_ref: (block_rows, D_pad)
    x = x_ref[...].astype(jnp.float32)

    if d_valid == d_padded:
        mean = jnp.mean(x, axis=-1, keepdims=True)
        d = x - mean
        var = jnp.mean(d * d, axis=-1, keepdims=True)     # biased, matches torch .mean
    else:
        # Padded lanes are zero, so sum(x) already equals the sum over real lanes.
        inv_n = 1.0 / float(d_valid)
        mean = jnp.sum(x, axis=-1, keepdims=True) * inv_n
        lane = jax.lax.broadcasted_iota(jnp.int32, x.shape, dimension=x.ndim - 1)
        d = jnp.where(lane < d_valid, x - mean, 0.0)       # zero padded lanes of (x - mean)
        var = jnp.sum(d * d, axis=-1, keepdims=True) * inv_n

    inv_std = jax.lax.rsqrt(var + eps)                     # EUP rsqrt; avoids VPU divide
    # gamma/beta already f32 (cast hoisted to the wrapper).  Padded lanes of the
    # output are gamma_pad * 0 + beta_pad = 0 and are sliced off by the wrapper.
    o_ref[...] = (g_ref[...] * (d * inv_std) + b_ref[...]).astype(o_ref.dtype)


def _round_up(x, m):
    return ((x + m - 1) // m) * m


def _vmem_capacity_bytes():
    """Physical VMEM of the current TPU generation (conservative fallback)."""
    try:
        info = pltpu.get_tpu_info()
        cap = getattr(info, "vmem_capacity_bytes", None)
        if cap:
            return int(cap)
    except Exception:
        pass
    return 64 << 20  # assume v7x-class (smallest) if the query is unavailable


def layer_norm(x, gamma, beta, *, eps=1e-5, block_rows=None):
    """LayerNorm over the trailing `gamma.ndim` dims of x (PyTorch semantics)."""
    orig_shape = x.shape
    assert x.shape[-gamma.ndim:] == gamma.shape, "parameters_shape must match trailing dims"
    D = int(gamma.size)
    x2 = x.reshape(-1, D)
    N = x2.shape[0]

    itemsize = jnp.dtype(x.dtype).itemsize
    # Sublane packing: 8 rows/vreg for 4-byte dtypes, 16 for 2-byte, 32 for 1-byte.
    sublane = max(8, 32 // itemsize)

    # Lane-dense hidden dim: pad to a multiple of 128 so stores are unmasked
    # full-vreg `vst`s.  No-op when D is already a multiple of 128.
    # TODO(synk): for tiny D (<128) a free row-packing reshape (N, D) ->
    # (N*D/128, 128) with an in-kernel segmented reduce would avoid the extra
    # pad/slice HBM passes entirely.
    D_pad = _round_up(D, 128)
    if D_pad != D:
        x2 = jnp.pad(x2, ((0, 0), (0, D_pad - D)))

    g2 = jnp.pad(gamma.reshape(1, D).astype(jnp.float32), ((0, 0), (0, D_pad - D)))
    b2 = jnp.pad(beta.reshape(1, D).astype(jnp.float32), ((0, 0), (0, D_pad - D)))

    # --- Generation-aware VMEM budgets -------------------------------------
    vmem_cap = _vmem_capacity_bytes()
    if vmem_cap <= (64 << 20):
        # v7x-class: 64 MiB per TensorCore.  ~16 MiB of pipelined data,
        # vmem_limit capped at 3/4 of physical (48 MiB).
        data_budget = vmem_cap // 4
    else:
        # v5e/v6e-class: 128 MiB.  ~48 MiB of pipelined data, cap 96 MiB.
        data_budget = (vmem_cap * 3) // 8
    vmem_ceiling = (vmem_cap * 3) // 4

    # Per-row footprint: (in + out) x 2 pipeline buffers at input dtype, plus
    # ~3 full-tile f32 intermediates inside the kernel body (x upcast / d,
    # d*d, scaled product).
    bytes_per_row = 2 * 2 * D_pad * itemsize + 3 * D_pad * 4

    if block_rows is None:
        block_rows = max(sublane, data_budget // bytes_per_row)

    # Dtype-aware sublane multiple; clamp to the (sublane-rounded) row count.
    block_rows = max(sublane, (block_rows // sublane) * sublane)
    block_rows = min(block_rows, _round_up(N, sublane))

    # Feed both TensorCores on v7x: make sure the "parallel" row grid has at
    # least 2 blocks whenever there is more than one sublane group of rows.
    # (Costs one extra ~0.35us grid step on single-TC parts -- negligible.)
    if N > sublane and pl.cdiv(N, block_rows) < 2:
        block_rows = max(sublane, _round_up(pl.cdiv(N, 2), sublane))

    num_blocks = pl.cdiv(N, block_rows)  # partial last block handled by OOB masking

    # Explicit VMEM limit sized from the actual footprint: pipelined in/out
    # buffers at input dtype + f32 intermediates + resident params + slack,
    # with 25% headroom, capped at 3/4 of physical VMEM.
    tile_in_bytes = block_rows * D_pad * itemsize
    tile_f32_bytes = block_rows * D_pad * 4
    need = 2 * 2 * tile_in_bytes + 3 * tile_f32_bytes + 2 * D_pad * 4 + (2 << 20)
    vmem_limit = int(min(vmem_ceiling, max(16 << 20, (need * 5) // 4)))

    kernel = functools.partial(_layernorm_kernel, eps=eps, d_valid=D, d_padded=D_pad)

    out = pl.pallas_call(
        kernel,
        out_shape=jax.ShapeDtypeStruct((N, D_pad), x.dtype),
        grid_spec=pltpu.PrefetchScalarGridSpec(
            num_scalar_prefetch=0,
            grid=(num_blocks,),
            in_specs=[
                # Note: mem-bound with trivial compute -> 2-deep buffering is
                # enough; only consider pipeline_mode=pl.Buffered(3) on
                # v5e/v6e if xprof shows exposed DMA at step boundaries.
                pl.BlockSpec((block_rows, D_pad), lambda i: (i, 0)),
                pl.BlockSpec((1, D_pad), lambda i: (0, 0)),
                pl.BlockSpec((1, D_pad), lambda i: (0, 0)),
            ],
            out_specs=pl.BlockSpec((block_rows, D_pad), lambda i: (i, 0)),
        ),
        compiler_params=pltpu.CompilerParams(
            dimension_semantics=("parallel",),   # row grid shards across TCs (v7x)
            vmem_limit_bytes=vmem_limit,
        ),
    )(x2, g2, b2)

    if D_pad != D:
        out = out[:, :D]
    return out.reshape(orig_shape)


if __name__ == "__main__":
    # Module init: parameters_shape = (hidden,) -> gamma = ones, beta = zeros
    batch, seq, hidden = 2, 8, 32
    key = jax.random.PRNGKey(0)
    x = jax.random.normal(key, (batch, seq, hidden), dtype=jnp.float32)

    gamma = jnp.ones((hidden,), dtype=jnp.float32)
    beta = jnp.zeros((hidden,), dtype=jnp.float32)

    out = layer_norm(x, gamma, beta, eps=1e-5)
    out = jax.block_until_ready(out)

    # Pure-JAX reference (matches PyTorch forward semantics)
    mean = jnp.mean(x, axis=-1, keepdims=True)
    var = jnp.mean((x - mean) ** 2, axis=-1, keepdims=True)
    ref = gamma * ((x - mean) / jnp.sqrt(var + 1e-5)) + beta
    assert jnp.allclose(out, ref, atol=1e-5, rtol=1e-5), "mismatch vs reference"

    print("KERNEL_OK")
</pallas_src>

<mosaic_0001>
module attributes {stable_mosaic.version = 11 : i64} {
  func.func @_layernorm_kernel(%arg0: i32, %arg1: memref<8x128xf32, #tpu.memory_space<vmem>>, %arg2: memref<1x128xf32, #tpu.memory_space<vmem>>, %arg3: memref<1x128xf32, #tpu.memory_space<vmem>>, %arg4: memref<8x128xf32, #tpu.memory_space<vmem>>) attributes {dimension_semantics = [#tpu.dimension_semantics<parallel>], iteration_bounds = array<i64: 2>, scalar_prefetch = 0 : i64, scratch_operands = 0 : i64, tpu.core_type = #tpu.core_type<tc>, window_params = [{transform_indices = @transform_0, window_bounds = array<i64: 8, 128>}, {pipeline_mode = #tpu.pipeline_mode<synchronous>, transform_indices = @transform_1, window_bounds = array<i64: 1, 128>}, {pipeline_mode = #tpu.pipeline_mode<synchronous>, transform_indices = @transform_2, window_bounds = array<i64: 1, 128>}, {transform_indices = @transform_3, window_bounds = array<i64: 8, 128>}]} {
    %c0 = arith.constant 0 : index
    %c0_0 = arith.constant 0 : index
    %0 = vector.load %arg1[%c0, %c0_0] : memref<8x128xf32, #tpu.memory_space<vmem>>, vector<8x128xf32>
    %cst = arith.constant dense<0.000000e+00> : vector<8xf32>
    %1 = vector.multi_reduction <add>, %0, %cst [1] : vector<8x128xf32> to vector<8xf32>
    %2 = vector.shape_cast %1 : vector<8xf32> to vector<8x1xf32>
    %cst_1 = arith.constant 3.125000e-02 : f32
    %3 = vector.broadcast %cst_1 : f32 to vector<8x1xf32>
    %4 = arith.mulf %2, %3 : vector<8x1xf32>
    %5 = tpu.iota {dimensions = array<i32: 1>} : vector<8x128xi32>
    %c32_i32 = arith.constant 32 : i32
    %6 = vector.broadcast %c32_i32 : i32 to vector<8x128xi32>
    %7 = arith.cmpi slt, %5, %6 : vector<8x128xi32>
    %8 = vector.broadcast %4 : vector<8x1xf32> to vector<8x128xf32>
    %9 = arith.subf %0, %8 : vector<8x128xf32>
    %cst_2 = arith.constant 0.000000e+00 : f32
    %10 = vector.broadcast %cst_2 : f32 to vector<8x128xf32>
    %11 = arith.select %7, %9, %10 : vector<8x128xi1>, vector<8x128xf32>
    %12 = arith.mulf %11, %11 : vector<8x128xf32>
    %cst_3 = arith.constant dense<0.000000e+00> : vector<8xf32>
    %13 = vector.multi_reduction <add>, %12, %cst_3 [1] : vector<8x128xf32> to vector<8xf32>
    %14 = vector.shape_cast %13 : vector<8xf32> to vector<8x1xf32>
    %cst_4 = arith.constant 3.125000e-02 : f32
    %15 = vector.broadcast %cst_4 : f32 to vector<8x1xf32>
    %16 = arith.mulf %14, %15 : vector<8x1xf32>
    %cst_5 = arith.constant 9.99999974E-6 : f32
    %17 = vector.broadcast %cst_5 : f32 to vector<8x1xf32>
    %18 = arith.addf %16, %17 : vector<8x1xf32>
    %19 = math.rsqrt %18 : vector<8x1xf32>
    %c0_6 = arith.constant 0 : index
    %c0_7 = arith.constant 0 : index
    %20 = vector.load %arg2[%c0_6, %c0_7] : memref<1x128xf32, #tpu.memory_space<vmem>>, vector<1x128xf32>
    %21 = vector.broadcast %19 : vector<8x1xf32> to vector<8x128xf32>
    %22 = arith.mulf %11, %21 : vector<8x128xf32>
    %23 = vector.broadcast %20 : vector<1x128xf32> to vector<8x128xf32>
    %24 = arith.mulf %23, %22 : vector<8x128xf32>
    %c0_8 = arith.constant 0 : index
    %c0_9 = arith.constant 0 : index
    %25 = vector.load %arg3[%c0_8, %c0_9] : memref<1x128xf32, #tpu.memory_space<vmem>>, vector<1x128xf32>
    %26 = vector.broadcast %25 : vector<1x128xf32> to vector<8x128xf32>
    %27 = arith.addf %24, %26 : vector<8x128xf32>
    %c0_10 = arith.constant 0 : index
    %c0_11 = arith.constant 0 : index
    %28 = vector.load %arg4[%c0_10, %c0_11] : memref<8x128xf32, #tpu.memory_space<vmem>>, vector<8x128xf32>
    tpu.vector_store %arg4[%c0_10, %c0_11], %27 {strides = array<i32>} : memref<8x128xf32, #tpu.memory_space<vmem>>, vector<8x128xf32>,
    return
  }
  func.func @transform_0(%arg0: i32) -> (i32, i32) {
    %c0_i32 = arith.constant 0 : i32
    %c0_i32_0 = arith.constant 0 : i32
    return %arg0, %c0_i32 : i32, i32
  }
  func.func @transform_1(%arg0: i32) -> (i32, i32) {
    %c0_i32 = arith.constant 0 : i32
    %c0_i32_0 = arith.constant 0 : i32
    %c0_i32_1 = arith.constant 0 : i32
    return %c0_i32, %c0_i32_0 : i32, i32
  }
  func.func @transform_2(%arg0: i32) -> (i32, i32) {
    %c0_i32 = arith.constant 0 : i32
    %c0_i32_0 = arith.constant 0 : i32
    %c0_i32_1 = arith.constant 0 : i32
    return %c0_i32, %c0_i32_0 : i32, i32
  }
  func.func @transform_3(%arg0: i32) -> (i32, i32) {
    %c0_i32 = arith.constant 0 : i32
    %c0_i32_0 = arith.constant 0 : i32
    return %arg0, %c0_i32 : i32, i32
  }
}

</mosaic_0001>

<bundles_post_ra>
// kernel: tpu_custom_call.1
= control target key start
LH: loop header
LB: loop body
LE: loop exit
PB: predicated region body
PF: predicated region fallthrough
CT: control target
= control target key end

     0   :  { %8 = vsyncpa [#allocation3], 0  ;;  %s652_s0 = inlined_call_operand.hbm [shape: f32[16,128], index: 0, kind: input, shape index: {}]   ;;  %s653_s1 = inlined_call_operand.vmem [shape: f32[1,128], index: 1, kind: input, shape index: {}]   ;;  %s654_s2 = inlined_call_operand.vmem [shape: f32[1,128], index: 2, kind: input, shape index: {}]   ;;  %s655_s3 = inlined_call_operand.hbm [shape: f32[16,128], index: 3, kind: output, shape index: {}]  }
   0x1   :  { %10 = vsyncpa [#allocation3 + $0x1], 0 }
   0x2   :  { %11 = vsyncpa [#allocation4], 0 }
   0x3   :  { %13 = vsyncpa [#allocation4 + $0x1], 0  ;;  %s485_s12 = smov 0   ;;  %s487_s13 = smov 0  }
   0x4   :  { %s489_s14 = smov 0   ;;  %s491_s15 = smov 0  }
   0x5 LB: > { %s506_s16 = sadd.s32 4294967295, %s461_s15   ;;  %s303_s17 = sadd.s32 4294967294, %s461_s15   ;;  %s461_s15 = sphi %s491_s15, %s670_s15   ;;  %s457_s14 = sphi %s489_s14, %s669_s14   ;;  %s453_s13 = sphi %s487_s13, %s668_s13   ;;  %s449_s12 = sphi %s485_s12, %s667_s12  }
   0x6   : > { %s510_s18 = sadd.s32 1, %s461_s15   ;;  %s26_s19 = sadd.s32 1, %s457_s14 }
   0x7   : > { %s23_s20 = ssub.s32 %s461_s15, %s510_s18  ;;  %p33_p0 = scmp.ne.s32.totalorder %s457_s14, %s453_s13 }
   0x8   : > { %p24_p1 = scmp.eq.s32.totalorder %s23_s20, 0  ;;  %p34_p2 = scmp.eq.s32.totalorder %s461_s15, 0 }
   0x9   : > { %p39_p3 = scmp.ne.s32.totalorder %s453_s13, %s449_s12  ;;  %p40_p4 = scmp.eq.s32.totalorder %s506_s16, 0 }
   0xa   : > { %s522_s21 = scalar_select %p24_p1, %s457_s14, %s26_s19  }
   0xb   : > { %p524_p5 = por %p34_p2, %p33_p0  ;;  %p528_p6 = por %p40_p4, %p39_p3 }
   0xc   : > { %p105_p7 = scmp.eq.s32.totalorder %s506_s16, 1  ;;  %p111_p8 = scmp.eq.s32.totalorder %s303_s17, 1 }
   0xd   : > { %p329_p10 = scmp.lt.s32.totalorder %s461_s15, 2  ;;  %s137_s26 = sand.u32 1, %s457_s14  }
   0xe   : > { %p535_p11 = por %p105_p7, %p33_p0  ;;  %p539_p12 = por %p111_p8, %p39_p3 }
   0xf   : > { %s307_s27 = sshll.u32 %s461_s15, 7  ;;  %s306_s28 = sshll.u32 %s137_s26, 3 }
  0x10   : > { %s659_s24 = scalar_select %p535_p11, 1, 0 }
  0x11   : > { %s660_s25 = scalar_select %p539_p12, 1, 0 }
  0x12   : > { %s548_s4 = scalar_lea.hbm %s652_s0, %s307_s27  ;;  %s141_s5 = scalar_lea.vmem [#allocation2], %s306_s28 }
  0x13   : > { %s148_s6 = sshll.u32 %s141_s5, 4  ;;  %p552_p13 = pnand %p329_p10, %p524_p5  ;;  %s556_s6 = int_to_ptr.vmem [resolvable:$true] %s148_s6 }
  0x14   : > { %s138_s8 = scalar_lea.sflag [#allocation3], %s137_s26  ;;  %s365_s9 = scalar_lea.hbm %s548_s4, 128 }
  0x15   : > { %p366_p2 = scmp.ne.s32.totalorder %s548_s4, %s365_s9  ;;  %p367_p3 = pneg %p552_p13 }
  0x16   : > { %s370_s17 = scalar_lea.hbm %s652_s0, 256  ;;  %p371_p5 = scmp.lt.u32.totalorder %s548_s4, %s652_s0 }
  0x17   : > { %p368_p4 = pnand %p367_p3, %p366_p2  ;;  %p372_p8 = scmp.lt.u32.totalorder %s370_s17, %s365_s9 }
  0x18   : > { %p374_p9 = scmp.lt.u32.totalorder %s365_s9, %s548_s4 }
  0x19   : > { %p369_p7 = pneg %p368_p4  ;;  %p373_p10 = por %p372_p8, %p371_p5 }
  0x1b   : > { %p375_p0 = por %p374_p9, %p373_p10 }
  0x1d   : > { %p376_p1 = pnand %p375_p0, %p369_p7 }
  0x1f   : > { %379 = shalt.err (!%p376_p1)
}
  0x20   : > { %s380_s22 = scalar_lea.vmem %s556_s6, 128  ;;  %s463_s26 = smov [#allocation2]  }
  0x21   : > { %p381_p2 = scmp.ne.s32.totalorder %s556_s6, %s380_s22  ;;  %s385_s27 = sshll.u32 %s463_s26, 4  ;;  %s386_s27 = int_to_ptr.vmem [resolvable:$false] %s385_s27 }
  0x22   : > { %s387_s28 = scalar_lea.vmem %s386_s27, 256  ;;  %p388_p11 = scmp.lt.s32.totalorder %s556_s6, %s386_s27 }
  0x23   : > { %p383_p4 = pnand %p381_p2, %p367_p3  ;;  %p389_p5 = scmp.lt.s32.totalorder %s387_s28, %s380_s22 }
  0x25   : > { %p384_p12 = pneg %p383_p4  ;;  %p390_p8 = por %p389_p5, %p388_p11 }
  0x27   : > { %p391_p9 = pnand %p390_p8, %p384_p12 }
  0x29   : > { %394 = shalt.err (!%p391_p9)
}
  0x2a   : > { %324 = dma.hbm_to_vmem [thread:$0]  (!%p552_p13), %s548_s4, 128, %s556_s6, %s138_s8  }
  0x2b   : > { %p662_p0 = scmp.lt.s32.totalorder %s461_s15, 3  ;;  %p663_p1 = scmp.ge.s32.totalorder %s461_s15, 1 }
  0x2d   : > { %p154_p3 = pnand %p663_p1, %p662_p0 }
  0x2e   : > { %s590_s29 = sand.u32 (!%p154_p3), 1, %s453_s13  }
  0x2f   : > { %157 = sbr.rel (%p154_p3) target bundleno = 382 (0x17e), region = 32  ;;  %s309_s30 = sshll.u32 (!%p154_p3), %s590_s29, 3 }
  0x30   : > { %s160_s5 = scalar_lea.sflag (!%p154_p3), [#allocation3], %s590_s29  ;;  %s163_s9 = scalar_lea.vmem (!%p154_p3), [#allocation2], %s309_s30 }
  0x36   : > { %440 = dma.done.wait (%p528_p6), %s160_s5, 128  }
  0x37   : > { %442 = vsyncadd (%p528_p6), %s160_s5, 4294967168  ;;  %v186_v0 = vld [vmem:[%s163_s9] sm:$0xff]  ;;  %v190_v1 = vlaneseq  ;;  %s314_s8 = sshll.u32 %s506_s16, 7  ;;  %s185_s10 = scalar_lea.vmem [#allocation5], %s309_s30 }
  0x38   : > { %187 = vadd.xlane.f32.xlu0 %v186_v0  ;;  %v311_v12 = vld [vmem:[%s653_s1] ss:$0 sm:$0xff]  ;;  %s233_s11 = sshll.u32 %s185_s10, 4  ;;  %s608_s20 = scalar_lea.hbm %s655_s3, %s314_s8  ;;  %s610_s11 = int_to_ptr.vmem [resolvable:$true] %s233_s11 }
  0x39   : > { %v191_v2 = vand.u32 127, %v190_v1  ;;  %v312_v14 = vld [vmem:[%s654_s2] ss:$0 sm:$0xff]  ;;  %s220_s22 = scalar_lea.sflag [#allocation4], %s590_s29  ;;  %s395_s26 = scalar_lea.vmem %s610_s11, 128 }
  0x3a   : > { %p396_p6 = scmp.ne.s32.totalorder %s610_s11, %s395_s26  ;;  %p664_p11 = scmp.ne.s32.totalorder %s659_s24, 0 }
  0x3b   : > { %vm192_vm0 = vcmp.lt.s32.totalorder %v191_v2, 32  ;;  %s464_s16 = smov [#allocation5]  }
  0x3c   : > { %p397_p12 = pnand %p396_p6, %p664_p11  ;;  %s399_s27 = sshll.u32 %s464_s16, 4  ;;  %s400_s27 = int_to_ptr.vmem [resolvable:$false] %s399_s27 }
  0x3d   : > { %s401_s28 = scalar_lea.vmem %s400_s27, 256  ;;  %p402_p7 = scmp.lt.s32.totalorder %s610_s11, %s400_s27 }
  0x3e   : > { %p398_p13 = pneg %p397_p12  ;;  %p403_p10 = scmp.lt.s32.totalorder %s401_s28, %s395_s26 }
  0x40   : > { %p404_p2 = por %p403_p10, %p402_p7 }
  0x42   : > { %p405_p4 = pnand %p404_p2, %p398_p13 }
  0xc5   : > { %v188_v3 = vpop.xlane.xlu0 %187 }
  0xc6   : > { %v189_v4 = vmul.f32 0.03125, %v188_v3 }
  0xc8   : > { %v193_v5 = vsub.f32 %v186_v0, %v189_v4 }
  0xca   : > { %v194_v6 = vsel %vm192_vm0, %v193_v5, 0.0 }
  0xcb   : > { %v195_v7 = vmul.f32 %v194_v6, %v194_v6 }
  0xcd   : > { %196 = vadd.xlane.f32.xlu0 %v195_v7 }
 0x15a   : > { %v197_v8 = vpop.xlane.xlu0 %196 }
 0x15b   : > { %v198_v9 = vmul.f32 0.03125, %v197_v8 }
 0x15d   : > { %v199_v10 = vadd.f32 1e-05, %v198_v9 }
 0x15f   : > { %363 = vrsqrt.f32 %v199_v10 }
 0x169   : > { %v364_v11 = vpop.eup %363 }
 0x16a   : > { %v202_v13 = vmul.f32 %v364_v11, %v194_v6 }
 0x16c   : > { %v209_v15 = vmul.f32 %v311_v12, %v202_v13 }
 0x16e   : > { %v217_v16 = vadd.f32 %v312_v14, %v209_v15 }
 0x170   : > { %218 = vst [vmem:[%s185_s10] sm:$0xff] %v217_v16 }
 0x171   : > { %408 = shalt.err (!%p405_p4)
}
 0x172   : > { %s409_s29 = scalar_lea.hbm %s608_s20, 128  ;;  %s413_s9 = scalar_lea.hbm %s655_s3, 256 }
 0x173   : > { %p410_p5 = scmp.ne.s32.totalorder %s608_s20, %s409_s29  ;;  %p414_p0 = scmp.lt.u32.totalorder %s608_s20, %s655_s3 }
 0x174   : > { %p415_p1 = scmp.lt.u32.totalorder %s413_s9, %s409_s29  ;;  %p417_p6 = scmp.lt.u32.totalorder %s409_s29, %s608_s20 }
 0x175   : > { %p411_p8 = pnand %p410_p5, %p664_p11 }
 0x176   : > { %p416_p3 = por %p415_p1, %p414_p0 }
 0x177   : > { %p412_p9 = pneg %p411_p8 }
 0x178   : > { %p418_p12 = por %p417_p6, %p416_p3 }
 0x17a   : > { %p419_p13 = pnand %p418_p12, %p412_p9 }
 0x17c   : > { %422 = shalt.err (!%p419_p13)
}
 0x17d   : > { %319 = dma.vmem_to_hbm [thread:$0]  (%p664_p11), %s610_s11, 128, %s608_s20, %s220_s22  }
 0x17e PF: > { %s245_s6 = sand.u32 1, %s449_s12   ;;  %p665_p7 = scmp.ne.s32.totalorder %s660_s25, 0 }
 0x17f   : > { %p666_p10 = scmp.ge.s32.totalorder %s461_s15, 2  ;;  %s246_s7 = scalar_lea.sflag [#allocation4], %s245_s6 }
 0x181   : > { %p326_p2 = pnand %p666_p10, %p665_p7 }
 0x183   : > { %444 = dma.done.wait (!%p326_p2), %s246_s7, 128  }
 0x184   : > { %446 = vsyncadd (!%p326_p2), %s246_s7, 4294967168  ;;  %p16_p4 = scmp.ge.s32.totalorder %s510_s18, 4   ;;  %s667_s12 = smov %s453_s13 }
 0x185   : > { %s668_s13 = smov %s457_s14  ;;  %s669_s14 = smov %s522_s21 }
 0x186   : > { %s670_s15 = smov %s510_s18  ;;  %18 = sbr.rel (!%p16_p4) target bundleno = 5 (0x5), region = 77 }
 0x18d   :  { %251 = vsyncpa [#allocation3], 1 }
 0x18e   :  { %253 = vsyncpa [#allocation3 + $0x1], 1 }
 0x18f   :  { %254 = vsyncpa [#allocation4], 1 }
 0x190   :  { %256 = vsyncpa [#allocation4 + $0x1], 1 }

</bundles_post_ra>
